<compile_context>
chip_gen: v6e
topology: v6e:2x2x1
jax: 0.10.0
libtpu: 0.0.40
codegen_flags: <defaults>
</compile_context>

<pallas_src>
import functools

import jax
import jax.numpy as jnp
import numpy as np
from jax.experimental import pallas as pl
from jax.experimental.pallas import tpu as pltpu


_SQRT_HALF = 0.7071067811865476  # 1/sqrt(2)


def _round_up(v, m):
    return ((v + m - 1) // m) * m


def _mlp_kernel(x_ref, w1_ref, b1_ref, w2_ref, b2_ref, o_ref, acc_ref, *,
                approximate_gelu):
    """Grid = (token tile i, hidden chunk k).

    Per (i, k):   acc += gelu(x_i @ W1[:, k_chunk] + b1[k_chunk]) @ W2[k_chunk, :]
    k == last:    o_i  = acc + b2
    """
    k = pl.program_id(1)

    @pl.when(k == 0)
    def _init():
        acc_ref[...] = jnp.zeros_like(acc_ref)

    # fc1 chunk on the MXU (bf16 operands by default), f32 accumulation.
    h = jnp.dot(x_ref[...], w1_ref[...], preferred_element_type=jnp.float32)
    h = h + b1_ref[...]

    if approximate_gelu:
        # tanh form lowers to the EUP slot (essentially free behind the MXU).
        h = jax.nn.gelu(h, approximate=True)
    else:
        # Exact erf GELU (PyTorch nn.GELU default).
        h = 0.5 * h * (1.0 + jax.lax.erf(h * jnp.float32(_SQRT_HALF)))

    # Back to the MXU compute dtype for fc2; accumulate in f32 scratch.
    h = h.astype(w2_ref.dtype)
    acc_ref[...] += jnp.dot(h, w2_ref[...], preferred_element_type=jnp.float32)

    @pl.when(k == pl.num_programs(1) - 1)
    def _finalize():
        o_ref[...] = (acc_ref[...] + b2_ref[...]).astype(o_ref.dtype)


def mlp_forward(x, params, *, compute_dtype=jnp.bfloat16,
                approximate_gelu=False, tm_max=512, tk_max=512):
    """y = fc2(gelu(fc1(x))).  x: (..., in_features).  Eval mode (drop=0.0)."""
    w1 = params["w_fc1"]   # (C_in, H)   -- pre-transposed (in, out)
    b1 = params["b_fc1"]   # (1, H)
    w2 = params["w_fc2"]   # (H, C_out)
    b2 = params["b_fc2"]   # (1, C_out)

    c_in, hidden = w1.shape
    c_out = w2.shape[1]
    assert x.shape[-1] == c_in
    out_dtype = x.dtype

    lead_shape = x.shape[:-1]
    m = int(np.prod(lead_shape)) if lead_shape else 1
    x2 = x.reshape(m, c_in)

    # ---- feature dims padded to 128 lanes (unmasked stores / clean MXU) ----
    c_in_p = _round_up(c_in, 128)
    c_out_p = _round_up(c_out, 128)
    hid_p = _round_up(hidden, 128)

    # ---- tile sizes --------------------------------------------------------
    tm = min(tm_max, _round_up(m, 8))
    m_pad = _round_up(m, tm)
    # Prefer >= 2 token tiles so the "parallel" axis can span both v7x cores.
    while m_pad // tm < 2 and tm > 8:
        tm = _round_up(max(8, tm // 2), 8)
        m_pad = _round_up(m, tm)

    tk = min(tk_max, hid_p)
    hid_p = _round_up(hid_p, tk)

    # ---- pad + cast operands (zero padding is exact) -----------------------
    x2 = jnp.pad(x2, ((0, m_pad - m), (0, c_in_p - c_in))).astype(compute_dtype)
    w1p = jnp.pad(w1, ((0, c_in_p - c_in), (0, hid_p - hidden))).astype(compute_dtype)
    b1p = jnp.pad(b1, ((0, 0), (0, hid_p - hidden))).astype(jnp.float32)
    w2p = jnp.pad(w2, ((0, hid_p - hidden), (0, c_out_p - c_out))).astype(compute_dtype)
    b2p = jnp.pad(b2, ((0, 0), (0, c_out_p - c_out))).astype(jnp.float32)

    grid = (m_pad // tm, hid_p // tk)

    # ---- VMEM budget: double-buffered tiles + f32 accumulator --------------
    def _nbytes(shape, dt):
        return int(np.prod(shape)) * jnp.dtype(dt).itemsize

    need = 2 * (_nbytes((tm, c_in_p), compute_dtype)     # x tile
                + _nbytes((c_in_p, tk), compute_dtype)   # W1 chunk
                + _nbytes((1, tk), jnp.float32)          # b1 chunk
                + _nbytes((tk, c_out_p), compute_dtype)  # W2 chunk
                + _nbytes((1, c_out_p), jnp.float32)     # b2
                + _nbytes((tm, c_out_p), out_dtype))     # out tile
    need += _nbytes((tm, c_out_p), jnp.float32)          # accumulator scratch
    # Headroom, clamped to stay within v7x's 64 MiB per-TC VMEM.
    vmem_limit = int(min(max(2 * need, 32 * 1024 * 1024), 56 * 1024 * 1024))

    kernel = functools.partial(_mlp_kernel, approximate_gelu=approximate_gelu)

    out2 = pl.pallas_call(
        kernel,
        out_shape=jax.ShapeDtypeStruct((m_pad, c_out_p), out_dtype),
        grid_spec=pltpu.PrefetchScalarGridSpec(
            num_scalar_prefetch=0,
            grid=grid,
            in_specs=[
                pl.BlockSpec((tm, c_in_p), lambda i, k: (i, 0)),    # x tile
                pl.BlockSpec((c_in_p, tk), lambda i, k: (0, k)),    # W1 chunk
                pl.BlockSpec((1, tk), lambda i, k: (0, k)),         # b1 chunk
                pl.BlockSpec((tk, c_out_p), lambda i, k: (k, 0)),   # W2 chunk
                pl.BlockSpec((1, c_out_p), lambda i, k: (0, 0)),    # b2
            ],
            out_specs=pl.BlockSpec((tm, c_out_p), lambda i, k: (i, 0)),
            scratch_shapes=[pltpu.VMEM((tm, c_out_p), jnp.float32)],
        ),
        compiler_params=pltpu.CompilerParams(
            dimension_semantics=("parallel", "arbitrary"),
            vmem_limit_bytes=vmem_limit,
        ),
    )(x2, w1p, b1p, w2p, b2p)

    out2 = out2[:m, :c_out]
    return out2.reshape(*lead_shape, c_out)


def mlp_reference(x, params, compute_dtype=jnp.float32):
    """Pure-JAX reference mirroring the PyTorch Mlp forward (eval mode)."""
    cd = compute_dtype
    h = jnp.dot(x.astype(cd), params["w_fc1"].astype(cd),
                preferred_element_type=jnp.float32) + params["b_fc1"][0]
    h = 0.5 * h * (1.0 + jax.lax.erf(h * _SQRT_HALF))
    y = jnp.dot(h.astype(cd), params["w_fc2"].astype(cd),
                preferred_element_type=jnp.float32) + params["b_fc2"][0]
    return y.astype(x.dtype)


if __name__ == "__main__":
    # Small shapes consistent with the module: tokens (B, N, C), hidden = 4*C.
    B, N, C = 2, 8, 32
    H = 4 * C

    key = jax.random.PRNGKey(0)
    k1, k2, k3, k4, k5 = jax.random.split(key, 5)

    params = {
        "w_fc1": 0.05 * jax.random.normal(k1, (C, H), jnp.float32),
        "b_fc1": 0.02 * jax.random.normal(k2, (1, H), jnp.float32),
        "w_fc2": 0.05 * jax.random.normal(k3, (H, C), jnp.float32),
        "b_fc2": 0.02 * jax.random.normal(k4, (1, C), jnp.float32),
    }
    x = jax.random.normal(k5, (B, N, C), jnp.float32)

    out = jax.block_until_ready(mlp_forward(x, params))

    # Tight check vs. a reference that applies the same bf16 casts.
    ref_bf16 = mlp_reference(x, params, jnp.bfloat16)
    np.testing.assert_allclose(np.asarray(out), np.asarray(ref_bf16),
                               rtol=2e-3, atol=2e-3)
    # Looser check vs. the pure-f32 PyTorch-equivalent math (bf16 MXU rounding).
    ref_f32 = mlp_reference(x, params, jnp.float32)
    np.testing.assert_allclose(np.asarray(out), np.asarray(ref_f32),
                               rtol=3e-2, atol=3e-2)

    print("KERNEL_OK")
</pallas_src>

<mosaic_0001>
module attributes {stable_mosaic.version = 11 : i64} {
  func.func @_mlp_kernel(%arg0: i32, %arg1: i32, %arg2: memref<8x128xbf16, #tpu.memory_space<vmem>>, %arg3: memref<128x128xbf16, #tpu.memory_space<vmem>>, %arg4: memref<1x128xf32, #tpu.memory_space<vmem>>, %arg5: memref<128x128xbf16, #tpu.memory_space<vmem>>, %arg6: memref<1x128xf32, #tpu.memory_space<vmem>>, %arg7: memref<8x128xf32, #tpu.memory_space<vmem>>, %arg8: memref<8x128xf32, #tpu.memory_space<vmem>>) attributes {dimension_semantics = [#tpu.dimension_semantics<parallel>, #tpu.dimension_semantics<arbitrary>], iteration_bounds = array<i64: 2, 1>, scalar_prefetch = 0 : i64, scratch_operands = 1 : i64, tpu.core_type = #tpu.core_type<tc>, window_params = [{transform_indices = @transform_0, window_bounds = array<i64: 8, 128>}, {transform_indices = @transform_1, window_bounds = array<i64: 128, 128>}, {transform_indices = @transform_2, window_bounds = array<i64: 1, 128>}, {transform_indices = @transform_3, window_bounds = array<i64: 128, 128>}, {pipeline_mode = #tpu.pipeline_mode<synchronous>, transform_indices = @transform_4, window_bounds = array<i64: 1, 128>}, {transform_indices = @transform_5, window_bounds = array<i64: 8, 128>}]} {
    %c0_i32 = arith.constant 0 : i32
    %0 = arith.cmpi eq, %arg1, %c0_i32 : i32
    %1 = arith.extui %0 : i1 to i32
    %c0_i32_0 = arith.constant 0 : i32
    %2 = arith.cmpi ne, %1, %c0_i32_0 : i32
    scf.if %2 {
      %cst_18 = arith.constant 0.000000e+00 : f32
      %26 = vector.broadcast %cst_18 : f32 to vector<8x128xf32>
      %c0_19 = arith.constant 0 : index
      %c0_20 = arith.constant 0 : index
      %27 = vector.load %arg8[%c0_19, %c0_20] : memref<8x128xf32, #tpu.memory_space<vmem>>, vector<8x128xf32>
      tpu.vector_store %arg8[%c0_19, %c0_20], %26 {strides = array<i32>} : memref<8x128xf32, #tpu.memory_space<vmem>>, vector<8x128xf32>,
    } else {
    }
    %c0 = arith.constant 0 : index
    %c0_1 = arith.constant 0 : index
    %3 = vector.load %arg2[%c0, %c0_1] : memref<8x128xbf16, #tpu.memory_space<vmem>>, vector<8x128xbf16>
    %c0_2 = arith.constant 0 : index
    %c0_3 = arith.constant 0 : index
    %4 = vector.load %arg3[%c0_2, %c0_3] : memref<128x128xbf16, #tpu.memory_space<vmem>>, vector<128x128xbf16>
    %cst = arith.constant dense<0.000000e+00> : vector<8x128xf32>
    %5 = tpu.matmul %3, %4, %cst {dimension_numbers = #tpu.dot_dimension_numbers<[1], [0], [0], [1], [0, 0, 1, 1], [], []>} : vector<8x128xbf16>, vector<128x128xbf16>, vector<8x128xf32> -> vector<8x128xf32>
    %c0_4 = arith.constant 0 : index
    %c0_5 = arith.constant 0 : index
    %6 = vector.load %arg4[%c0_4, %c0_5] : memref<1x128xf32, #tpu.memory_space<vmem>>, vector<1x128xf32>
    %7 = vector.broadcast %6 : vector<1x128xf32> to vector<8x128xf32>
    %8 = arith.addf %5, %7 : vector<8x128xf32>
    %cst_6 = arith.constant 5.000000e-01 : f32
    %9 = vector.broadcast %cst_6 : f32 to vector<8x128xf32>
    %10 = arith.mulf %9, %8 : vector<8x128xf32>
    %cst_7 = arith.constant 0.707106769 : f32
    %11 = vector.broadcast %cst_7 : f32 to vector<8x128xf32>
    %12 = arith.mulf %8, %11 : vector<8x128xf32>
    %13 = math.erf %12 : vector<8x128xf32>
    %cst_8 = arith.constant 1.000000e+00 : f32
    %14 = vector.broadcast %cst_8 : f32 to vector<8x128xf32>
    %15 = arith.addf %14, %13 : vector<8x128xf32>
    %16 = arith.mulf %10, %15 : vector<8x128xf32>
    %17 = arith.truncf %16 : vector<8x128xf32> to vector<8x128xbf16>
    %c0_9 = arith.constant 0 : index
    %c0_10 = arith.constant 0 : index
    %18 = vector.load %arg8[%c0_9, %c0_10] : memref<8x128xf32, #tpu.memory_space<vmem>>, vector<8x128xf32>
    %c0_11 = arith.constant 0 : index
    %c0_12 = arith.constant 0 : index
    %19 = vector.load %arg5[%c0_11, %c0_12] : memref<128x128xbf16, #tpu.memory_space<vmem>>, vector<128x128xbf16>
    %cst_13 = arith.constant dense<0.000000e+00> : vector<8x128xf32>
    %20 = tpu.matmul %17, %19, %cst_13 {dimension_numbers = #tpu.dot_dimension_numbers<[1], [0], [0], [1], [0, 0, 1, 1], [], []>} : vector<8x128xbf16>, vector<128x128xbf16>, vector<8x128xf32> -> vector<8x128xf32>
    %21 = arith.addf %18, %20 : vector<8x128xf32>
    %c0_14 = arith.constant 0 : index
    %c0_15 = arith.constant 0 : index
    %22 = vector.load %arg8[%c0_14, %c0_15] : memref<8x128xf32, #tpu.memory_space<vmem>>, vector<8x128xf32>
    tpu.vector_store %arg8[%c0_14, %c0_15], %21 {strides = array<i32>} : memref<8x128xf32, #tpu.memory_space<vmem>>, vector<8x128xf32>,
    %c0_i32_16 = arith.constant 0 : i32
    %23 = arith.cmpi eq, %arg1, %c0_i32_16 : i32
    %24 = arith.extui %23 : i1 to i32
    %c0_i32_17 = arith.constant 0 : i32
    %25 = arith.cmpi ne, %24, %c0_i32_17 : i32
    scf.if %25 {
      %c0_18 = arith.constant 0 : index
      %c0_19 = arith.constant 0 : index
      %26 = vector.load %arg8[%c0_18, %c0_19] : memref<8x128xf32, #tpu.memory_space<vmem>>, vector<8x128xf32>
      %c0_20 = arith.constant 0 : index
      %c0_21 = arith.constant 0 : index
      %27 = vector.load %arg6[%c0_20, %c0_21] : memref<1x128xf32, #tpu.memory_space<vmem>>, vector<1x128xf32>
      %28 = vector.broadcast %27 : vector<1x128xf32> to vector<8x128xf32>
      %29 = arith.addf %26, %28 : vector<8x128xf32>
      %c0_22 = arith.constant 0 : index
      %c0_23 = arith.constant 0 : index
      %30 = vector.load %arg7[%c0_22, %c0_23] : memref<8x128xf32, #tpu.memory_space<vmem>>, vector<8x128xf32>
      tpu.vector_store %arg7[%c0_22, %c0_23], %29 {strides = array<i32>} : memref<8x128xf32, #tpu.memory_space<vmem>>, vector<8x128xf32>,
    } else {
    }
    return
  }
  func.func @transform_0(%arg0: i32, %arg1: i32) -> (i32, i32) {
    %c0_i32 = arith.constant 0 : i32
    %c0_i32_0 = arith.constant 0 : i32
    return %arg0, %c0_i32 : i32, i32
  }
  func.func @transform_1(%arg0: i32, %arg1: i32) -> (i32, i32) {
    %c0_i32 = arith.constant 0 : i32
    %c0_i32_0 = arith.constant 0 : i32
    return %c0_i32, %arg1 : i32, i32
  }
  func.func @transform_2(%arg0: i32, %arg1: i32) -> (i32, i32) {
    %c0_i32 = arith.constant 0 : i32
    %c0_i32_0 = arith.constant 0 : i32
    return %c0_i32, %arg1 : i32, i32
  }
  func.func @transform_3(%arg0: i32, %arg1: i32) -> (i32, i32) {
    %c0_i32 = arith.constant 0 : i32
    %c0_i32_0 = arith.constant 0 : i32
    return %arg1, %c0_i32 : i32, i32
  }
  func.func @transform_4(%arg0: i32, %arg1: i32) -> (i32, i32) {
    %c0_i32 = arith.constant 0 : i32
    %c0_i32_0 = arith.constant 0 : i32
    %c0_i32_1 = arith.constant 0 : i32
    return %c0_i32, %c0_i32_0 : i32, i32
  }
  func.func @transform_5(%arg0: i32, %arg1: i32) -> (i32, i32) {
    %c0_i32 = arith.constant 0 : i32
    %c0_i32_0 = arith.constant 0 : i32
    return %arg0, %c0_i32 : i32, i32
  }
}

</mosaic_0001>

<bundles_post_ra>
// kernel: tpu_custom_call.1
= control target key start
LH: loop header
LB: loop body
LE: loop exit
PB: predicated region body
PF: predicated region fallthrough
CT: control target
= control target key end

     0   :  { %s1281_s0 = inlined_call_operand.hbm [shape: bf16[16,128], index: 0, kind: input, shape index: {}]   ;;  %s1282_s1 = inlined_call_operand.hbm [shape: bf16[128,128], index: 1, kind: input, shape index: {}]   ;;  %s1283_s2 = inlined_call_operand.vmem [shape: f32[1,128], index: 2, kind: input, shape index: {}]   ;;  %s1284_s3 = inlined_call_operand.hbm [shape: bf16[128,128], index: 3, kind: input, shape index: {}]   ;;  %s1285_s4 = inlined_call_operand.vmem [shape: f32[1,128], index: 4, kind: input, shape index: {}]   ;;  %s1286_s5 = inlined_call_operand.hbm [shape: f32[16,128], index: 5, kind: output, shape index: {}]  }
   0x1   :  { %1290 = sst [smem:[#allocation13_spill]] %s1282_s1 }
   0x2   :  { %10 = vsyncpa [#allocation4], 0 }
   0x3   :  { %12 = vsyncpa [#allocation4 + $0x1], 0 }
   0x4   :  { %13 = vsyncpa [#allocation7], 0 }
   0x5   :  { %14 = vsyncpa [#allocation5], 0 }
   0x6   :  { %16 = vsyncpa [#allocation5 + $0x1], 0  ;;  %s1085_s18 = smov 0   ;;  %s1087_s19 = smov 0  }
   0x7   :  { %s1089_s20 = smov 0   ;;  %s1091_s21 = smov 0  }
   0x8   :  { %s1093_s22 = smov 0   ;;  %s1095_s23 = smov 0  }
   0x9 LB: > { %s682_s24 = sadd.s32 4294967295, %s1045_s23   ;;  %s683_s25 = sadd.s32 4294967294, %s1045_s23   ;;  %s1045_s23 = sphi %s1095_s23, %s22_s23   ;;  %s1041_s22 = sphi %s1093_s22, %s1308_s22   ;;  %s1037_s21 = sphi %s1091_s21, %s1307_s21   ;;  %s1033_s20 = sphi %s1089_s20, %s1306_s20   ;;  %s1029_s19 = sphi %s1087_s19, %s1305_s19   ;;  %s1025_s18 = sphi %s1085_s18, %s1304_s18  }
   0xa   : > { %p54_p0 = scmp.ne.s32.totalorder %s1029_s19, %s1025_s18  ;;  %p1119_p1 = scmp.eq.s32.totalorder %s682_s24, 0 }
   0xb   : > { %p1123_p2 = scmp.eq.s32.totalorder %s682_s24, 1  ;;  %p183_p3 = scmp.eq.s32.totalorder %s683_s25, 1 }
   0xc   : > { %s1291_s26 = scalar_select %p1119_p1, 1, 0 }
   0xd   : > { %p1129_p4 = por %p1119_p1, %p54_p0  ;;  %p684_p5 = scmp.ge.s32.totalorder %s1045_s23, 1 }
   0xe   : > { %p1134_p6 = por %p183_p3, %p54_p0  ;;  %p190_p7 = scmp.lt.s32.totalorder %s1045_s23, 3 }
   0xf   : > { %s1293_s28 = scalar_select %p1129_p4, 1, 0 }
  0x10   : > { %s1294_s29 = scalar_select %p1134_p6, 1, 0 }
  0x11   : > { %p1139_p8 = pnand %p684_p5, %p190_p7  ;;  %s1047_s6 = smov [#allocation6]  }
  0x12   : > { %s204_s7 = sshll.u32 %s1047_s6, 4  ;;  %s1048_s9 = smov [#allocation8]   ;;  %s205_s7 = int_to_ptr.vmem [resolvable:$true] %s204_s7 }
  0x13   : > { %p788_p9 = pneg %p1139_p8  ;;  %s226_s10 = sshll.u32 %s1048_s9, 4  ;;  %s227_s10 = int_to_ptr.vmem [resolvable:$true] %s226_s10 }
  0x14   : > { %s892_s11 = scalar_lea.vmem %s205_s7, 1024  ;;  %p900_p5 = scmp.lt.s32.totalorder %s205_s7, %s205_s7 }
  0x15   : > { %p1148_p11 = pnand %p788_p9, %p1119_p1  ;;  %p893_p13 = scmp.ne.s32.totalorder %s205_s7, %s892_s11 }
  0x16   : > { %p901_p7 = scmp.lt.s32.totalorder %s892_s11, %s892_s11 }
  0x17   : > { %p883_p12 = pneg %p1148_p11 }
  0x18   : > { %p902_p10 = por %p901_p7, %p900_p5 }
  0x19   : > { %p895_p0 = pnand %p893_p13, %p883_p12 }
  0x1b   : > { %p896_p3 = pneg %p895_p0 }
  0x1d   : > { %p903_p9 = pnand %p902_p10, %p896_p3 }
  0x1f   : > { %906 = shalt.err (!%p903_p9)
}
  0x20   : > { %s1049_s12 = smov 64   ;;  %s1050_s13 = smov 4  }
  0x21   : > { %s1297_s1 = sld [smem:[#allocation13_spill]]  ;;  %s918_s16 = scalar_lea.vmem %s227_s10, 1024 }
  0x22   : > { %p919_p6 = scmp.ne.s32.totalorder %s227_s10, %s918_s16  ;;  %p926_p1 = scmp.lt.s32.totalorder %s227_s10, %s227_s10 }
  0x23   : > { %p927_p4 = scmp.lt.s32.totalorder %s918_s16, %s918_s16 }
  0x24   : > { %p921_p13 = pnand %p919_p6, %p883_p12 }
  0x25   : > { %p928_p5 = por %p927_p4, %p926_p1 }
  0x26   : > { %p922_p0 = pneg %p921_p13 }
  0x27   : > { %791 = dma.hbm_to_vmem [thread:$0]  (!%p1148_p11), %s1297_s1, 1024, %s205_s7, [#allocation7], %s1049_s12, %s1049_s12, %s1050_s13  }
  0x28   : > { %p929_p10 = pnand %p928_p5, %p922_p0 }
  0x2a   : > { %932 = shalt.err (!%p929_p10)
}
  0x2b   : > { %794 = dma.hbm_to_vmem [thread:$0]  (!%p1148_p11), %s1284_s3, 1024, %s227_s10, [#allocation7], %s1049_s12, %s1049_s12, %s1050_s13  }
  0x2c   : > { %s34_s25 = sadd.s32 1, %s1041_s22  ;;  %s41_s6 = sadd.s32 1, %s1033_s20 }
  0x2d   : > { %p36_p1 = scmp.ge.s32.totalorder %s34_s25, 2  ;;  %p48_p4 = scmp.ne.s32.totalorder %s1033_s20, %s1029_s19 }
  0x2e   : > { %p49_p6 = scmp.eq.s32.totalorder %s1045_s23, 0  ;;  %p805_p12 = scmp.lt.s32.totalorder %s1045_s23, 2 }
  0x2f   : > { %s1310_s25 = smov (%p36_p1, %s34_s25), 0  ;;  %p1180_p7 = por %p1123_p2, %p48_p4 }
  0x30   : > { %p50_p3 = por %p49_p6, %p48_p4  ;;  %s38_s8 = ssub.s32 %s1041_s22, %s1310_s25 }
  0x31   : > { %s243_s9 = sand.u32 1, %s1033_s20   ;;  %p39_p9 = scmp.eq.s32.totalorder %s38_s8, 0 }
  0x32   : > { %s689_s10 = sshll.u32 %s243_s9, 2  ;;  %s690_s11 = sshll.u32 %s1041_s22, 6 }
  0x33   : > { %s1189_s12 = scalar_select %p39_p9, %s1033_s20, %s41_s6  }
  0x34   : > { %s252_s15 = scalar_lea.hbm %s1281_s0, %s690_s11  ;;  %s247_s16 = scalar_lea.vmem [#allocation3], %s689_s10 }
  0x35   : > { %s254_s17 = sshll.u32 %s247_s16, 4  ;;  %p1196_p11 = pnand %p805_p12, %p50_p3  ;;  %s255_s17 = int_to_ptr.vmem [resolvable:$true] %s254_s17 }
  0x36   : > { %s244_s24 = scalar_lea.sflag [#allocation4], %s243_s9  ;;  %s946_s8 = scalar_lea.vmem %s255_s17, 64 }
  0x37   : > { %p935_p2 = pneg %p1196_p11  ;;  %p947_p13 = scmp.ne.s32.totalorder %s255_s17, %s946_s8 }
  0x38   : > { %s1051_s6 = smov [#allocation3]  }
  0x39   : > { %p949_p0 = pnand %p947_p13, %p935_p2  ;;  %s951_s1 = sshll.u32 %s1051_s6, 4  ;;  %s952_s1 = int_to_ptr.vmem [resolvable:$false] %s951_s1 }
  0x3a   : > { %s953_s11 = scalar_lea.vmem %s952_s1, 128  ;;  %p954_p10 = scmp.lt.s32.totalorder %s255_s17, %s952_s1 }
  0x3b   : > { %p950_p5 = pneg %p949_p0  ;;  %p955_p1 = scmp.lt.s32.totalorder %s953_s11, %s946_s8 }
  0x3d   : > { %p956_p4 = por %p955_p1, %p954_p10 }
  0x3f   : > { %p957_p6 = pnand %p956_p4, %p950_p5 }
  0x41   : > { %960 = shalt.err (!%p957_p6)
}
  0x42   : > { %798 = dma.hbm_to_vmem [thread:$0]  (!%p1196_p11), %s252_s15, 64, %s255_s17, %s244_s24  }
  0x43   : > { %263 = sbr.rel (%p1139_p8) target bundleno = 536 (0x218), region = 40  ;;  %s1207_s9 = sand.u32 (!%p1139_p8), 1, %s1029_s19  }
  0x44   : > { %s692_s10 = sshll.u32 (!%p1139_p8), %s1207_s9, 2  ;;  %s266_s13 = scalar_lea.sflag (!%p1139_p8), [#allocation4], %s1207_s9 }
  0x45   : > { %s1211_s14 = scalar_lea.vmem (!%p1139_p8), [#allocation3], %s692_s10  ;;  %p1300_p12 = scmp.ne.s32.totalorder (!%p1139_p8), %s1293_s28, 0 }
  0x48   : > { %1012 = dma.done.wait (%p1300_p12), %s266_s13, 64  }
  0x49   : > { %1014 = vsyncadd (%p1300_p12), %s266_s13, 4294967232  ;;  %p1301_p3 = scmp.ne.s32.totalorder %s1291_s26, 0 }
  0x4b   : > { %1016 = dma.done.wait (%p1301_p3), [#allocation7], 2048  }
  0x4c   : > { %1018 = vsyncadd (%p1301_p3), [#allocation7], 4294965248  ;;  %v1052_v0 = vmov 0.0   ;;  %vm1053_vm0 = vmmov 0   ;;  %v863_v1 = vld [vmem:[#allocation6 + $0x38] sm:$0xff]   ;;  %v864_v2 = vld [vmem:[#allocation6 + $0x30] sm:$0xff]  }
  0x4d   : > { %736 = vmatprep.subr.bf16.mxu0 %v1052_v0  ;;  %752 = vmatprep.mubr.msk.bf16.mxu0 %vm1053_vm0, %v1052_v0  ;;  %v865_v3 = vld [vmem:[#allocation6 + $0x28] sm:$0xff]   ;;  %v871_v4 = vld [vmem:[#allocation8 + $0x38] sm:$0xff]   ;;  %v866_v5 = vld [vmem:[#allocation6 + $0x20] sm:$0xff]   ;;  %s695_s28 = sshll.u32 %s1207_s9, 3  ;;  %s715_s16 = sshll.u32 %s1037_s21, 7 }
  0x4e   : > { %756 = vmatprep.subr.bf16.mxu1 %v1052_v0  ;;  %772 = vmatprep.mubr.msk.bf16.mxu1 %vm1053_vm0, %v1052_v0  ;;  %v872_v6 = vld [vmem:[#allocation8 + $0x30] sm:$0xff]   ;;  %v867_v7 = vld [vmem:[#allocation6 + $0x18] sm:$0xff]   ;;  %v869_v9 = vld [vmem:[#allocation6 + $0x8] sm:$0xff]   ;;  %s306_s17 = scalar_lea.vmem [#allocation9], %s695_s28  ;;  %s1233_s6 = scalar_lea.hbm %s1286_s5, %s715_s16 }
  0x4f   : > { %737 = vmatpush3.bf16.msra.mxu0 %v863_v1  ;;  %757 = vmatpush3.bf16.msra.mxu1 %v871_v4  ;;  %v868_v8 = vld [vmem:[#allocation6 + $0x10] sm:$0xff]   ;;  %v870_v10 = vld [vmem:[#allocation6] sm:$0xff]   ;;  %v317_v11 = vld [vmem:[%s1211_s14] sm:$0xf]  ;;  %s569_s27 = sshll.u32 %s306_s17, 4  ;;  %s556_s11 = scalar_lea.sflag [#allocation5], %s1207_s9  ;;  %s1235_s27 = int_to_ptr.vmem [resolvable:$true] %s569_s27 }
  0x50   : > { %738 = vmatprep.subr.bf16.mxu0 %v1052_v0  ;;  %758 = vmatprep.subr.bf16.mxu1 %v1052_v0  ;;  %v873_v12 = vld [vmem:[#allocation8 + $0x28] sm:$0xff]   ;;  %v874_v13 = vld [vmem:[#allocation8 + $0x20] sm:$0xff]   ;;  %v875_v14 = vld [vmem:[#allocation8 + $0x18] sm:$0xff]   ;;  %s961_s10 = scalar_lea.vmem %s1235_s27, 128  ;;  %s1054_s21 = smov [#allocation9]  }
  0x51   : > { %v876_v15 = vld [vmem:[#allocation8 + $0x10] sm:$0xff]   ;;  %v877_v16 = vld [vmem:[#allocation8 + $0x8] sm:$0xff]   ;;  %v878_v17 = vld [vmem:[#allocation8] sm:$0xff]   ;;  %p962_p8 = scmp.ne.s32.totalorder %s1235_s27, %s961_s10  ;;  %s965_s13 = sshll.u32 %s1054_s21, 4  ;;  %s966_s13 = int_to_ptr.vmem [resolvable:$false] %s965_s13 }
  0x52   : > { %v696_v18 = vld [vmem:[%s1283_s2] ss:$0 sm:$0xff]  ;;  %s967_s14 = scalar_lea.vmem %s966_s13, 256  ;;  %p968_p2 = scmp.lt.s32.totalorder %s1235_s27, %s966_s13 }
  0x53   : > { %739 = vmatpush3.bf16.msra.mxu0 %v864_v2  ;;  %759 = vmatpush3.bf16.msra.mxu1 %v872_v6  ;;  %v713_v30 = vld [vmem:[%s1285_s4] ss:$0 sm:$0xff]  ;;  %p963_p9 = pnand %p962_p8, %p1180_p7  ;;  %p969_p13 = scmp.lt.s32.totalorder %s967_s14, %s961_s10 }
  0x54   : > { %740 = vmatprep.subr.bf16.mxu0 %v1052_v0  ;;  %760 = vmatprep.subr.bf16.mxu1 %v1052_v0 }
  0x55   : > { %p964_p11 = pneg %p963_p9  ;;  %p970_p0 = por %p969_p13, %p968_p2 }
  0x57   : > { %741 = vmatpush3.bf16.msra.mxu0 %v865_v3  ;;  %761 = vmatpush3.bf16.msra.mxu1 %v873_v12  ;;  %p971_p5 = pnand %p970_p0, %p964_p11 }
  0x58   : > { %742 = vmatprep.subr.bf16.mxu0 %v1052_v0  ;;  %762 = vmatprep.subr.bf16.mxu1 %v1052_v0 }
  0x5b   : > { %743 = vmatpush3.bf16.msra.mxu0 %v866_v5  ;;  %763 = vmatpush3.bf16.msra.mxu1 %v874_v13 }
  0x5c   : > { %744 = vmatprep.subr.bf16.mxu0 %v1052_v0  ;;  %764 = vmatprep.subr.bf16.mxu1 %v1052_v0 }
  0x5f   : > { %745 = vmatpush3.bf16.msra.mxu0 %v867_v7  ;;  %765 = vmatpush3.bf16.msra.mxu1 %v875_v14 }
  0x60   : > { %746 = vmatprep.subr.bf16.mxu0 %v1052_v0  ;;  %766 = vmatprep.subr.bf16.mxu1 %v1052_v0 }
  0x63   : > { %747 = vmatpush3.bf16.msra.mxu0 %v868_v8  ;;  %767 = vmatpush3.bf16.msra.mxu1 %v876_v15 }
  0x64   : > { %748 = vmatprep.subr.bf16.mxu0 %v1052_v0  ;;  %768 = vmatprep.subr.bf16.mxu1 %v1052_v0 }
  0x67   : > { %749 = vmatpush3.bf16.msra.mxu0 %v869_v9  ;;  %769 = vmatpush3.bf16.msra.mxu1 %v877_v16 }
  0x68   : > { %750 = vmatprep.subr.bf16.mxu0 %v1052_v0  ;;  %770 = vmatprep.subr.bf16.mxu1 %v1052_v0 }
  0x6b   : > { %751 = vmatpush3.bf16.msra.mxu0 %v870_v10  ;;  %771 = vmatpush3.bf16.msra.mxu1 %v878_v17 }
  0x6e   : > { %753 = vmatmul.mubr.bf16.vlgmr.msra.gmra.mxu0 %v317_v11 }
 0x12e   : > { %v423_v19 = vpop.f32.mrf.mxu0 }
 0x12f   : > { %v424_v20 = vadd.f32 %v696_v18, %v423_v19 }
 0x130   : > { %v754_v21 = vpop.f32.mrf.mxu0 }
 0x131   : > { %v430_v22 = vmul.f32 0.70710677, %v424_v20  ;;  %v429_v26 = vmul.f32 0.5, %v424_v20 }
 0x132   : > { %v426_v23 = vpop.f32.mrf.mxu0 }
 0x133   : > { %879 = verf.f32 %v430_v22 }
 0x134   : > { %v755_v24 = vpop.f32.mrf.mxu0 }
 0x140   : > { %v880_v25 = vpop.eup %879 }
 0x141   : > { %v432_v27 = vadd.f32 1.0, %v880_v25 }
 0x143   : > { %v433_v28 = vmul.f32 %v432_v27, %v429_v26 }
 0x145   : > { %v434_v29 = vpack.c.bf16 %v433_v28, %v433_v28 }
 0x147   : > { %773 = vmatmul.mubr.bf16.vlgmr.msra.gmra.mxu1 %v434_v29 }
 0x207   : > { %v534_v31 = vpop.f32.mrf.mxu1 }
 0x208   : > { %v553_v32 = vadd.f32 %v713_v30, %v534_v31 }
 0x209   : > { %v774_v33 = vpop.f32.mrf.mxu1 }
 0x20a   : > { %554 = vst [vmem:[%s306_s17] sm:$0xff] %v553_v32 }
 0x20b   : > { %v537_v34 = vpop.f32.mrf.mxu1 }
 0x20c   : > { %974 = shalt.err (!%p971_p5)
}
 0x20d   : > { %s975_s1 = scalar_lea.hbm %s1233_s6, 128  ;;  %s979_s28 = scalar_lea.hbm %s1286_s5, 256 }
 0x20e   : > { %p976_p10 = scmp.ne.s32.totalorder %s1233_s6, %s975_s1  ;;  %p980_p6 = scmp.lt.s32.totalorder %s1233_s6, %s1286_s5 }
 0x20f   : > { %p981_p12 = scmp.lt.s32.totalorder %s979_s28, %s975_s1 }
 0x210   : > { %p977_p1 = pnand %p976_p10, %p1180_p7 }
 0x211   : > { %p982_p3 = por %p981_p12, %p980_p6 }
 0x212   : > { %p978_p4 = pneg %p977_p1 }
 0x214   : > { %p983_p8 = pnand %p982_p3, %p978_p4 }
 0x216   : > { %986 = shalt.err (!%p983_p8)
}
 0x217   : > { %786 = dma.vmem_to_hbm [thread:$0]  (%p1180_p7), %s1235_s27, 128, %s1233_s6, %s556_s11   ;;  %v775_v35 = vpop.f32.mrf.mxu1 }
 0x218 PF: > { %s581_s16 = sand.u32 1, %s1025_s18   ;;  %p1302_p9 = scmp.ne.s32.totalorder %s1294_s29, 0 }
 0x219   : > { %p1303_p11 = scmp.ge.s32.totalorder %s1045_s23, 2  ;;  %s582_s17 = scalar_lea.sflag [#allocation5], %s581_s16 }
 0x21b   : > { %p800_p2 = pnand %p1303_p11, %p1302_p9 }
 0x21d   : > { %p801_p13 = pneg %p800_p2 }
 0x21f   : > { %1020 = dma.done.wait (%p801_p13), %s582_s17, 128  }
 0x220   : > { %1022 = vsyncadd (%p801_p13), %s582_s17, 4294967168  ;;  %s22_s23 = sadd.s32 1, %s1045_s23   ;;  %s1304_s18 = smov %s1029_s19 }
 0x221   : > { %p19_p0 = scmp.ge.s32.totalorder %s22_s23, 4   ;;  %s1305_s19 = smov %s1033_s20 }
 0x222   : > { %s1306_s20 = smov %s1189_s12  ;;  %s1307_s21 = smov %s1041_s22 }
 0x223   : > { %s1308_s22 = smov %s1310_s25  ;;  %21 = sbr.rel (!%p19_p0) target bundleno = 9 (0x9), region = 106 }
 0x228   :  { %587 = vsyncpa [#allocation4], 1 }
 0x229   :  { %589 = vsyncpa [#allocation4 + $0x1], 1 }
 0x22a   :  { %590 = vsyncpa [#allocation7], 1 }
 0x22b   :  { %591 = vsyncpa [#allocation5], 1 }
 0x22c   :  { %593 = vsyncpa [#allocation5 + $0x1], 1 }

</bundles_post_ra>
